<compile_context>
chip_gen: v7x
topology: tpu7x:2x2x1
jax: 0.10.0
libtpu: 0.0.40
codegen_flags: <defaults>
</compile_context>

<pallas_src>
import jax
import jax.numpy as jnp
from jax.experimental import pallas as pl
from jax.experimental.pallas import tpu as pltpu

LANE = 128  # TPU lane width


def _round_up(x, m):
    return (x + m - 1) // m * m


def _num_tensorcores():
    """Best-effort TensorCores-per-chip query (v5e/v6e: 1, v7x: 2)."""
    try:
        info = pltpu.get_tpu_info()
        for attr in ("num_cores", "num_tensorcores", "tensorcore_count"):
            n = getattr(info, attr, None)
            if isinstance(n, int) and n > 0:
                return n
    except Exception:
        pass
    try:
        kind = jax.devices()[0].device_kind.lower()
        if "v7" in kind:
            return 2
    except Exception:
        pass
    return 1


def _choose_block_b(bp, num_cores):
    """Pick the batch tile.

    Single-TC chips or small batches: one big tile (grid=(1,)) -- splitting is
    a serial loop that only doubles per-step overhead.  Dual-TC (v7x) splits
    only when each core gets >= 128 rows.  Cap at 512 rows (measured ~85% of
    HBM roofline on v6e; well within VMEM for 128-wide tiles).
    """
    cap = 512
    if bp <= cap and (num_cores < 2 or bp < num_cores * 128):
        return bp
    for cand in (512, 256, 128):
        if cand <= bp and pl.cdiv(bp, cand) >= max(num_cores, 1):
            return cand
    return min(bp, 128)


def mlp_kernel(x_ref, w0_ref, b0_ref, w1_ref, b1_ref,
               w2_ref, b2_ref, w3_ref, b3_ref, o_ref):
    """Fused 4-layer MLP on one batch tile. bf16 MXU operands, f32 accumulation."""
    h = jnp.dot(x_ref[...], w0_ref[...],
                preferred_element_type=jnp.float32) + b0_ref[...]
    h = jnp.maximum(h, 0.0).astype(jnp.bfloat16)      # ReLU in f32, carry bf16
    h = jnp.dot(h, w1_ref[...],
                preferred_element_type=jnp.float32) + b1_ref[...]
    h = jnp.maximum(h, 0.0).astype(jnp.bfloat16)      # ReLU in f32, carry bf16
    h = jnp.dot(h, w2_ref[...],
                preferred_element_type=jnp.float32) + b2_ref[...]
    h = h.astype(jnp.bfloat16)                        # no activation (matches reference)
    y = jnp.dot(h, w3_ref[...],
                preferred_element_type=jnp.float32) + b3_ref[...]
    o_ref[...] = y.astype(o_ref.dtype)                # bf16 store (half the vst bytes)


def prepare_params(params):
    """ONE-TIME prep (hoisted out of the per-call path): zero-pad every dim to a
    multiple of 128 lanes; weights -> bf16 (MXU operands), biases stay f32."""
    def pad_to(a, rows, cols):
        r, c = a.shape
        return jnp.pad(a, ((0, rows - r), (0, cols - c)))

    n_feature = params["w0"].shape[0]
    n_hidden = params["w1"].shape[0]
    n_output = params["w3"].shape[1]
    fp = _round_up(n_feature, LANE)
    hp = _round_up(n_hidden, LANE)
    op = _round_up(n_output, LANE)

    wdims = {"w0": (fp, hp), "w1": (hp, hp), "w2": (hp, hp), "w3": (hp, op)}
    arrays = {}
    for name, (r, c) in wdims.items():
        arrays[name] = pad_to(params[name], r, c).astype(jnp.bfloat16)
    for li, cols in zip(range(4), (hp, hp, hp, op)):
        arrays[f"b{li}"] = pad_to(params[f"b{li}"], 1, cols).astype(jnp.float32)

    dims = dict(n_feature=n_feature, n_hidden=n_hidden, n_output=n_output,
                fp=fp, hp=hp, op=op)
    return {"arrays": arrays, "dims": dims}


def net_forward(x, prepped, *, block_b=None):
    B, n_feature = x.shape
    d = prepped["dims"]
    a = prepped["arrays"]
    assert n_feature == d["n_feature"]
    fp, hp, op = d["fp"], d["hp"], d["op"]
    out_dtype = x.dtype

    # Batch padding + core-count-aware tile selection (8-row sublane alignment).
    num_cores = _num_tensorcores()
    bp = _round_up(B, 8)
    if block_b is None:
        block_b = _choose_block_b(bp, num_cores)
    bp = _round_up(bp, block_b)
    grid = (bp // block_b,)

    xp = jnp.pad(x, ((0, bp - B), (0, fp - n_feature))).astype(jnp.bfloat16)

    def replicated(arr):
        # Weights/biases resident for every grid step (constant block index).
        # TODO(synk): switch to pipeline_mode=pl.Buffered(1) / K-N weight tiling
        # if n_hidden is ever scaled toward v7x's 64 MiB VMEM budget.
        return pl.BlockSpec(arr.shape, lambda i: (0, 0))

    in_specs = [
        pl.BlockSpec((block_b, fp), lambda i: (i, 0)),   # x tiled over batch
        replicated(a["w0"]), replicated(a["b0"]),
        replicated(a["w1"]), replicated(a["b1"]),
        replicated(a["w2"]), replicated(a["b2"]),
        replicated(a["w3"]), replicated(a["b3"]),
    ]
    out_spec = pl.BlockSpec((block_b, op), lambda i: (i, 0))

    # Cost estimate: USEFUL (unpadded) flops; bytes = what is actually moved.
    nf, nh, no = d["n_feature"], d["n_hidden"], d["n_output"]
    flops = 2 * B * (nf * nh + nh * nh + nh * nh + nh * no)
    bytes_accessed = (
        int(xp.size) * 2
        + sum(int(v.size) * v.dtype.itemsize for v in a.values())
        + bp * op * 2)  # bf16 output store

    y = pl.pallas_call(
        mlp_kernel,
        out_shape=jax.ShapeDtypeStruct((bp, op), jnp.bfloat16),
        grid_spec=pltpu.PrefetchScalarGridSpec(
            num_scalar_prefetch=0,
            grid=grid,
            in_specs=in_specs,
            out_specs=out_spec,
        ),
        compiler_params=pltpu.CompilerParams(
            dimension_semantics=("parallel",)),
        cost_estimate=pl.CostEstimate(
            flops=flops, transcendentals=0, bytes_accessed=bytes_accessed),
    )(xp, a["w0"], a["b0"], a["w1"], a["b1"],
      a["w2"], a["b2"], a["w3"], a["b3"])

    # Slice off batch / output padding and restore the caller's dtype.
    return y[:B, :d["n_output"]].astype(out_dtype)


def init_params(key, n_feature, n_hidden, n_output):
    """Deterministic init mimicking PyTorch Linear default: U(-1/sqrt(fan_in), +)."""
    dims = [(n_feature, n_hidden), (n_hidden, n_hidden),
            (n_hidden, n_hidden), (n_hidden, n_output)]
    params = {}
    keys = jax.random.split(key, 2 * len(dims))
    for li, (fan_in, fan_out) in enumerate(dims):
        bound = 1.0 / (fan_in ** 0.5)
        # stored as (in, out): equivalent to PyTorch weight (out, in) transposed
        params[f"w{li}"] = jax.random.uniform(
            keys[2 * li], (fan_in, fan_out), jnp.float32, -bound, bound)
        params[f"b{li}"] = jax.random.uniform(
            keys[2 * li + 1], (1, fan_out), jnp.float32, -bound, bound)
    return params


def net_forward_ref(x, params):
    """Plain-JAX f32 reference for correctness check."""
    h = jnp.maximum(x @ params["w0"] + params["b0"], 0.0)
    h = jnp.maximum(h @ params["w1"] + params["b1"], 0.0)
    h = h @ params["w2"] + params["b2"]
    return h @ params["w3"] + params["b3"]


if __name__ == "__main__":
    key = jax.random.PRNGKey(0)
    k_data, k_param = jax.random.split(key)

    # Small shapes consistent with the module: 2-D points -> 2-class output.
    batch, n_feature, n_hidden, n_output = 64, 2, 32, 2

    # Mimic the script's data: normal around +2 and -2 with std 2, concatenated.
    half = batch // 2
    x0 = 2.0 + 2.0 * jax.random.normal(k_data, (half, n_feature), jnp.float32)
    x1 = -2.0 + 2.0 * jax.random.normal(jax.random.fold_in(k_data, 1),
                                        (half, n_feature), jnp.float32)
    x = jnp.concatenate([x0, x1], axis=0)

    params = init_params(k_param, n_feature, n_hidden, n_output)

    # Pad/cast weights ONCE (hoisted out of the per-call forward path).
    prepped = prepare_params(params)

    out = jax.block_until_ready(net_forward(x, prepped))

    ref = net_forward_ref(x, params)
    assert out.shape == (batch, n_output)
    # bf16 MXU operands / intermediates / output with f32 accumulation -> loose
    # tolerance vs the f32 reference (fine for classification logits/argmax).
    assert jnp.allclose(out, ref, atol=2e-1, rtol=5e-2), "mismatch vs reference"

    print("KERNEL_OK")
</pallas_src>

<mosaic_0001>
module attributes {stable_mosaic.version = 11 : i64} {
  func.func @mlp_kernel(%arg0: i32, %arg1: memref<64x128xbf16, #tpu.memory_space<vmem>>, %arg2: memref<128x128xbf16, #tpu.memory_space<vmem>>, %arg3: memref<1x128xf32, #tpu.memory_space<vmem>>, %arg4: memref<128x128xbf16, #tpu.memory_space<vmem>>, %arg5: memref<1x128xf32, #tpu.memory_space<vmem>>, %arg6: memref<128x128xbf16, #tpu.memory_space<vmem>>, %arg7: memref<1x128xf32, #tpu.memory_space<vmem>>, %arg8: memref<128x128xbf16, #tpu.memory_space<vmem>>, %arg9: memref<1x128xf32, #tpu.memory_space<vmem>>, %arg10: memref<64x128xbf16, #tpu.memory_space<vmem>>) attributes {dimension_semantics = [#tpu.dimension_semantics<parallel>], iteration_bounds = array<i64: 1>, scalar_prefetch = 0 : i64, scratch_operands = 0 : i64, tpu.core_type = #tpu.core_type<tc>, window_params = [{transform_indices = @transform_0, window_bounds = array<i64: 64, 128>}, {pipeline_mode = #tpu.pipeline_mode<synchronous>, transform_indices = @transform_1, window_bounds = array<i64: 128, 128>}, {pipeline_mode = #tpu.pipeline_mode<synchronous>, transform_indices = @transform_2, window_bounds = array<i64: 1, 128>}, {pipeline_mode = #tpu.pipeline_mode<synchronous>, transform_indices = @transform_3, window_bounds = array<i64: 128, 128>}, {pipeline_mode = #tpu.pipeline_mode<synchronous>, transform_indices = @transform_4, window_bounds = array<i64: 1, 128>}, {pipeline_mode = #tpu.pipeline_mode<synchronous>, transform_indices = @transform_5, window_bounds = array<i64: 128, 128>}, {pipeline_mode = #tpu.pipeline_mode<synchronous>, transform_indices = @transform_6, window_bounds = array<i64: 1, 128>}, {pipeline_mode = #tpu.pipeline_mode<synchronous>, transform_indices = @transform_7, window_bounds = array<i64: 128, 128>}, {pipeline_mode = #tpu.pipeline_mode<synchronous>, transform_indices = @transform_8, window_bounds = array<i64: 1, 128>}, {transform_indices = @transform_9, window_bounds = array<i64: 64, 128>}]} {
    %c0 = arith.constant 0 : index
    %c0_0 = arith.constant 0 : index
    %0 = vector.load %arg1[%c0, %c0_0] : memref<64x128xbf16, #tpu.memory_space<vmem>>, vector<64x128xbf16>
    %c0_1 = arith.constant 0 : index
    %c0_2 = arith.constant 0 : index
    %1 = vector.load %arg2[%c0_1, %c0_2] : memref<128x128xbf16, #tpu.memory_space<vmem>>, vector<128x128xbf16>
    %cst = arith.constant dense<0.000000e+00> : vector<64x128xf32>
    %2 = tpu.matmul %0, %1, %cst {dimension_numbers = #tpu.dot_dimension_numbers<[1], [0], [0], [1], [0, 0, 1, 1], [], []>} : vector<64x128xbf16>, vector<128x128xbf16>, vector<64x128xf32> -> vector<64x128xf32>
    %c0_3 = arith.constant 0 : index
    %c0_4 = arith.constant 0 : index
    %3 = vector.load %arg3[%c0_3, %c0_4] : memref<1x128xf32, #tpu.memory_space<vmem>>, vector<1x128xf32>
    %4 = vector.broadcast %3 : vector<1x128xf32> to vector<64x128xf32>
    %5 = arith.addf %2, %4 : vector<64x128xf32>
    %cst_5 = arith.constant 0.000000e+00 : f32
    %6 = vector.broadcast %cst_5 : f32 to vector<64x128xf32>
    %7 = arith.maximumf %5, %6 : vector<64x128xf32>
    %8 = arith.truncf %7 : vector<64x128xf32> to vector<64x128xbf16>
    %c0_6 = arith.constant 0 : index
    %c0_7 = arith.constant 0 : index
    %9 = vector.load %arg4[%c0_6, %c0_7] : memref<128x128xbf16, #tpu.memory_space<vmem>>, vector<128x128xbf16>
    %cst_8 = arith.constant dense<0.000000e+00> : vector<64x128xf32>
    %10 = tpu.matmul %8, %9, %cst_8 {dimension_numbers = #tpu.dot_dimension_numbers<[1], [0], [0], [1], [0, 0, 1, 1], [], []>} : vector<64x128xbf16>, vector<128x128xbf16>, vector<64x128xf32> -> vector<64x128xf32>
    %c0_9 = arith.constant 0 : index
    %c0_10 = arith.constant 0 : index
    %11 = vector.load %arg5[%c0_9, %c0_10] : memref<1x128xf32, #tpu.memory_space<vmem>>, vector<1x128xf32>
    %12 = vector.broadcast %11 : vector<1x128xf32> to vector<64x128xf32>
    %13 = arith.addf %10, %12 : vector<64x128xf32>
    %cst_11 = arith.constant 0.000000e+00 : f32
    %14 = vector.broadcast %cst_11 : f32 to vector<64x128xf32>
    %15 = arith.maximumf %13, %14 : vector<64x128xf32>
    %16 = arith.truncf %15 : vector<64x128xf32> to vector<64x128xbf16>
    %c0_12 = arith.constant 0 : index
    %c0_13 = arith.constant 0 : index
    %17 = vector.load %arg6[%c0_12, %c0_13] : memref<128x128xbf16, #tpu.memory_space<vmem>>, vector<128x128xbf16>
    %cst_14 = arith.constant dense<0.000000e+00> : vector<64x128xf32>
    %18 = tpu.matmul %16, %17, %cst_14 {dimension_numbers = #tpu.dot_dimension_numbers<[1], [0], [0], [1], [0, 0, 1, 1], [], []>} : vector<64x128xbf16>, vector<128x128xbf16>, vector<64x128xf32> -> vector<64x128xf32>
    %c0_15 = arith.constant 0 : index
    %c0_16 = arith.constant 0 : index
    %19 = vector.load %arg7[%c0_15, %c0_16] : memref<1x128xf32, #tpu.memory_space<vmem>>, vector<1x128xf32>
    %20 = vector.broadcast %19 : vector<1x128xf32> to vector<64x128xf32>
    %21 = arith.addf %18, %20 : vector<64x128xf32>
    %22 = arith.truncf %21 : vector<64x128xf32> to vector<64x128xbf16>
    %c0_17 = arith.constant 0 : index
    %c0_18 = arith.constant 0 : index
    %23 = vector.load %arg8[%c0_17, %c0_18] : memref<128x128xbf16, #tpu.memory_space<vmem>>, vector<128x128xbf16>
    %cst_19 = arith.constant dense<0.000000e+00> : vector<64x128xf32>
    %24 = tpu.matmul %22, %23, %cst_19 {dimension_numbers = #tpu.dot_dimension_numbers<[1], [0], [0], [1], [0, 0, 1, 1], [], []>} : vector<64x128xbf16>, vector<128x128xbf16>, vector<64x128xf32> -> vector<64x128xf32>
    %c0_20 = arith.constant 0 : index
    %c0_21 = arith.constant 0 : index
    %25 = vector.load %arg9[%c0_20, %c0_21] : memref<1x128xf32, #tpu.memory_space<vmem>>, vector<1x128xf32>
    %26 = vector.broadcast %25 : vector<1x128xf32> to vector<64x128xf32>
    %27 = arith.addf %24, %26 : vector<64x128xf32>
    %28 = arith.truncf %27 : vector<64x128xf32> to vector<64x128xbf16>
    %c0_22 = arith.constant 0 : index
    %c0_23 = arith.constant 0 : index
    %29 = vector.load %arg10[%c0_22, %c0_23] : memref<64x128xbf16, #tpu.memory_space<vmem>>, vector<64x128xbf16>
    tpu.vector_store %arg10[%c0_22, %c0_23], %28 {strides = array<i32>} : memref<64x128xbf16, #tpu.memory_space<vmem>>, vector<64x128xbf16>,
    return
  }
  func.func @transform_0(%arg0: i32) -> (i32, i32) {
    %c0_i32 = arith.constant 0 : i32
    %c0_i32_0 = arith.constant 0 : i32
    return %arg0, %c0_i32 : i32, i32
  }
  func.func @transform_1(%arg0: i32) -> (i32, i32) {
    %c0_i32 = arith.constant 0 : i32
    %c0_i32_0 = arith.constant 0 : i32
    %c0_i32_1 = arith.constant 0 : i32
    return %c0_i32, %c0_i32_0 : i32, i32
  }
  func.func @transform_2(%arg0: i32) -> (i32, i32) {
    %c0_i32 = arith.constant 0 : i32
    %c0_i32_0 = arith.constant 0 : i32
    %c0_i32_1 = arith.constant 0 : i32
    return %c0_i32, %c0_i32_0 : i32, i32
  }
  func.func @transform_3(%arg0: i32) -> (i32, i32) {
    %c0_i32 = arith.constant 0 : i32
    %c0_i32_0 = arith.constant 0 : i32
    %c0_i32_1 = arith.constant 0 : i32
    return %c0_i32, %c0_i32_0 : i32, i32
  }
  func.func @transform_4(%arg0: i32) -> (i32, i32) {
    %c0_i32 = arith.constant 0 : i32
    %c0_i32_0 = arith.constant 0 : i32
    %c0_i32_1 = arith.constant 0 : i32
    return %c0_i32, %c0_i32_0 : i32, i32
  }
  func.func @transform_5(%arg0: i32) -> (i32, i32) {
    %c0_i32 = arith.constant 0 : i32
    %c0_i32_0 = arith.constant 0 : i32
    %c0_i32_1 = arith.constant 0 : i32
    return %c0_i32, %c0_i32_0 : i32, i32
  }
  func.func @transform_6(%arg0: i32) -> (i32, i32) {
    %c0_i32 = arith.constant 0 : i32
    %c0_i32_0 = arith.constant 0 : i32
    %c0_i32_1 = arith.constant 0 : i32
    return %c0_i32, %c0_i32_0 : i32, i32
  }
  func.func @transform_7(%arg0: i32) -> (i32, i32) {
    %c0_i32 = arith.constant 0 : i32
    %c0_i32_0 = arith.constant 0 : i32
    %c0_i32_1 = arith.constant 0 : i32
    return %c0_i32, %c0_i32_0 : i32, i32
  }
  func.func @transform_8(%arg0: i32) -> (i32, i32) {
    %c0_i32 = arith.constant 0 : i32
    %c0_i32_0 = arith.constant 0 : i32
    %c0_i32_1 = arith.constant 0 : i32
    return %c0_i32, %c0_i32_0 : i32, i32
  }
  func.func @transform_9(%arg0: i32) -> (i32, i32) {
    %c0_i32 = arith.constant 0 : i32
    %c0_i32_0 = arith.constant 0 : i32
    return %arg0, %c0_i32 : i32, i32
  }
}

</mosaic_0001>

<bundles_post_ra>
// kernel: tpu_custom_call.1
= control target key start
LH: loop header
LB: loop body
LE: loop exit
PB: predicated region body
PF: predicated region fallthrough
CT: control target
= control target key end

     0   :  { %14 = vsyncpa [#allocation3], 0  ;;  %s1346_s0 = inlined_call_operand.hbm [shape: bf16[64,128], index: 0, kind: input, shape index: {}]   ;;  %s1347_s1 = inlined_call_operand.hbm [shape: bf16[128,128], index: 1, kind: input, shape index: {}]   ;;  %s1348_s2 = inlined_call_operand.vmem [shape: f32[1,128], index: 2, kind: input, shape index: {}]   ;;  %s1349_s3 = inlined_call_operand.hbm [shape: bf16[128,128], index: 3, kind: input, shape index: {}]   ;;  %s1350_s4 = inlined_call_operand.vmem [shape: f32[1,128], index: 4, kind: input, shape index: {}]   ;;  %s1351_s5 = inlined_call_operand.hbm [shape: bf16[128,128], index: 5, kind: input, shape index: {}]   ;;  %s1352_s6 = inlined_call_operand.vmem [shape: f32[1,128], index: 6, kind: input, shape index: {}]   ;;  %s1353_s7 = inlined_call_operand.hbm [shape: bf16[128,128], index: 7, kind: input, shape index: {}]   ;;  %s1354_s8 = inlined_call_operand.vmem [shape: f32[1,128], index: 8, kind: input, shape index: {}]   ;;  %s1355_s9 = inlined_call_operand.hbm [shape: bf16[64,128], index: 9, kind: output, shape index: {}]  }
   0x1   :  { %15 = vsyncpa [#allocation6], 0 }
   0x2   :  { %16 = vsyncpa [#allocation9], 0 }
   0x3   :  { %17 = vsyncpa [#allocation4], 0  ;;  %s1172_s30 = smov [#allocation5]   ;;  %s1173_s11 = smov [#allocation8]  }
   0x4   :  { %s35_s10 = sshll.u32 %s1172_s30, 4  ;;  %s63_s12 = sshll.u32 %s1173_s11, 4  ;;  %s36_s10 = int_to_ptr.vmem [resolvable:$true] %s35_s10  ;;  %s1230_s12 = int_to_ptr.vmem [resolvable:$true] %s63_s12 }
   0x5   :  { %s1032_s15 = scalar_lea.hbm %s1347_s1, 1024 }
   0x6   :  { %p1033_p0 = scmp.ne.s32.totalorder %s1347_s1, %s1032_s15  ;;  %p1036_p1 = scmp.lt.u32.totalorder %s1032_s15, %s1347_s1 }
   0x8   :  { %p1038_p2 = pnand %p1036_p1, %p1033_p0 }
   0xa   :  { %1041 = shalt.err (!%p1038_p2)
}
   0xb   :  { %s1042_s20 = scalar_lea.vmem %s36_s10, 1024  ;;  %p1047_p4 = scmp.lt.s32.totalorder %s36_s10, %s36_s10 }
   0xc   :  { %p1043_p3 = scmp.ne.s32.totalorder %s36_s10, %s1042_s20  ;;  %p1048_p5 = scmp.lt.s32.totalorder %s1042_s20, %s1042_s20 }
   0xe   :  { %p1049_p6 = por %p1048_p5, %p1047_p4 }
  0x10   :  { %p1050_p7 = pnand %p1049_p6, %p1043_p3 }
  0x12   :  { %1053 = shalt.err (!%p1050_p7)
}
  0x13   :  { %s1174_s21 = smov 64   ;;  %s1175_s22 = smov 4  }
  0x14   :  { %41 = dma.hbm_to_vmem [thread:$0]  %s1347_s1, 1024, %s36_s10, [#allocation6], %s1174_s21, %s1174_s21, %s1175_s22  }
  0x15   :  { %s1054_s27 = scalar_lea.hbm %s1351_s5, 1024 }
  0x16   :  { %p1055_p8 = scmp.ne.s32.totalorder %s1351_s5, %s1054_s27  ;;  %p1058_p9 = scmp.lt.u32.totalorder %s1054_s27, %s1351_s5 }
  0x18   :  { %p1060_p10 = pnand %p1058_p9, %p1055_p8 }
  0x1a   :  { %1063 = shalt.err (!%p1060_p10)
}
  0x1b   :  { %s1064_s13 = scalar_lea.vmem %s1230_s12, 1024  ;;  %p1069_p12 = scmp.lt.s32.totalorder %s1230_s12, %s1230_s12 }
  0x1c   :  { %p1065_p11 = scmp.ne.s32.totalorder %s1230_s12, %s1064_s13  ;;  %p1070_p13 = scmp.lt.s32.totalorder %s1064_s13, %s1064_s13 }
  0x1e   :  { %p1071_p0 = por %p1070_p13, %p1069_p12 }
  0x20   :  { %p1072_p1 = pnand %p1071_p0, %p1065_p11 }
  0x22   :  { %1075 = shalt.err (!%p1072_p1)
}
  0x23   :  { %69 = dma.hbm_to_vmem [thread:$0]  %s1351_s5, 1024, %s1230_s12, [#allocation9], %s1174_s21, %s1174_s21, %s1175_s22  }
  0x24   :  { %s1176_s14 = smov [#allocation2]   ;;  %s1177_s16 = smov [#allocation7]  }
  0x25   :  { %s23_s15 = sshll.u32 %s1176_s14, 4  ;;  %s49_s17 = sshll.u32 %s1177_s16, 4  ;;  %s24_s15 = int_to_ptr.vmem [resolvable:$true] %s23_s15  ;;  %s1267_s17 = int_to_ptr.vmem [resolvable:$true] %s49_s17 }
  0x26   :  { %s1076_s20 = scalar_lea.hbm %s1346_s0, 512 }
  0x27   :  { %p1077_p2 = scmp.ne.s32.totalorder %s1346_s0, %s1076_s20  ;;  %p1080_p3 = scmp.lt.u32.totalorder %s1076_s20, %s1346_s0 }
  0x29   :  { %p1082_p4 = pnand %p1080_p3, %p1077_p2 }
  0x2b   :  { %1085 = shalt.err (!%p1082_p4)
}
  0x2c   :  { %s1086_s5 = scalar_lea.vmem %s24_s15, 512  ;;  %p1091_p6 = scmp.lt.s32.totalorder %s24_s15, %s24_s15 }
  0x2d   :  { %p1087_p5 = scmp.ne.s32.totalorder %s24_s15, %s1086_s5  ;;  %p1092_p7 = scmp.lt.s32.totalorder %s1086_s5, %s1086_s5 }
  0x2f   :  { %p1093_p8 = por %p1092_p7, %p1091_p6 }
  0x31   :  { %p1094_p9 = pnand %p1093_p8, %p1087_p5 }
  0x33   :  { %1097 = shalt.err (!%p1094_p9)
}
  0x34   :  { %29 = dma.hbm_to_vmem [thread:$0]  %s1346_s0, 512, %s24_s15, [#allocation3], %s1174_s21, %s1174_s21, %s1175_s22  }
  0x35   :  { %s1098_s30 = scalar_lea.hbm %s1349_s3, 1024 }
  0x36   :  { %p1099_p10 = scmp.ne.s32.totalorder %s1349_s3, %s1098_s30  ;;  %p1102_p11 = scmp.lt.u32.totalorder %s1098_s30, %s1349_s3 }
  0x38   :  { %p1104_p12 = pnand %p1102_p11, %p1099_p10 }
  0x3a   :  { %1107 = shalt.err (!%p1104_p12)
}
  0x3b   :  { %s1108_s14 = scalar_lea.vmem %s1267_s17, 1024  ;;  %p1113_p0 = scmp.lt.s32.totalorder %s1267_s17, %s1267_s17 }
  0x3c   :  { %p1109_p13 = scmp.ne.s32.totalorder %s1267_s17, %s1108_s14  ;;  %p1114_p1 = scmp.lt.s32.totalorder %s1108_s14, %s1108_s14 }
  0x3e   :  { %p1115_p2 = por %p1114_p1, %p1113_p0 }
  0x40   :  { %p1116_p3 = pnand %p1115_p2, %p1109_p13 }
  0x42   :  { %1119 = shalt.err (!%p1116_p3)
}
  0x43   :  { %55 = dma.hbm_to_vmem [thread:$0]  %s1349_s3, 1024, %s1267_s17, [#allocation6], %s1174_s21, %s1174_s21, %s1175_s22  }
  0x44   :  { %s1178_s16 = smov [#allocation10]   ;;  %s1120_s23 = scalar_lea.hbm %s1353_s7, 1024 }
  0x45   :  { %s77_s18 = sshll.u32 %s1178_s16, 4  ;;  %p1121_p4 = scmp.ne.s32.totalorder %s1353_s7, %s1120_s23  ;;  %s78_s18 = int_to_ptr.vmem [resolvable:$true] %s77_s18 }
  0x46   :  { %p1124_p5 = scmp.lt.u32.totalorder %s1120_s23, %s1353_s7 }
  0x48   :  { %p1126_p6 = pnand %p1124_p5, %p1121_p4 }
  0x4a   :  { %1129 = shalt.err (!%p1126_p6)
}
  0x4b   :  { %s1130_s12 = scalar_lea.vmem %s78_s18, 1024  ;;  %p1135_p8 = scmp.lt.s32.totalorder %s78_s18, %s78_s18 }
  0x4c   :  { %p1131_p7 = scmp.ne.s32.totalorder %s78_s18, %s1130_s12  ;;  %p1136_p9 = scmp.lt.s32.totalorder %s1130_s12, %s1130_s12 }
  0x4e   :  { %p1137_p10 = por %p1136_p9, %p1135_p8 }
  0x50   :  { %p1138_p11 = pnand %p1137_p10, %p1131_p7 }
  0x52   :  { %1141 = shalt.err (!%p1138_p11)
}
  0x53   :  { %83 = dma.hbm_to_vmem [thread:$0]  %s1353_s7, 1024, %s78_s18, [#allocation9], %s1174_s21, %s1174_s21, %s1175_s22  }
  0x54   :  { %1164 = dma.done.wait [#allocation3], 512  }
  0x55   :  { %1165 = vsyncadd [#allocation3], 4294966784 }
  0x56   :  { %1166 = dma.done.wait [#allocation6], 2048  }
  0x57   :  { %1167 = vsyncadd [#allocation6], 4294965248 }
  0x58   :  { %1168 = dma.done.wait [#allocation9], 2048  }
  0x59   :  { %1169 = vsyncadd [#allocation9], 4294965248  ;;  %v996_v0 = vld [vmem:[#allocation5] sm:$0xff]   ;;  %v997_v1 = vld [vmem:[#allocation5 + $0x8] sm:$0xff]   ;;  %s1179_s11 = smov [#allocation11]  }
  0x5a   :  { %892 = vmatprep.subr.bf16.mxu0 %v996_v0  ;;  %v998_v2 = vld [vmem:[#allocation5 + $0x10] sm:$0xff]   ;;  %v999_v3 = vld [vmem:[#allocation5 + $0x18] sm:$0xff]   ;;  %v1004_v4 = vld [vmem:[#allocation2] sm:$0xff]   ;;  %s751_s13 = sshll.u32 %s1179_s11, 4  ;;  %s752_s13 = int_to_ptr.vmem [resolvable:$true] %s751_s13 }
  0x5b   :  { %893 = vmatpush3.bf16.msra.mxu0 %v996_v0  ;;  %908 = vmatprep.mubr.bf16.mxu0 %v1004_v4  ;;  %v1000_v5 = vld [vmem:[#allocation5 + $0x20] sm:$0xff]   ;;  %v1009_v7 = vld [vmem:[#allocation7 + $0x8] sm:$0xff]   ;;  %v1010_v9 = vld [vmem:[#allocation7 + $0x10] sm:$0xff]   ;;  %p1147_p13 = scmp.lt.s32.totalorder %s752_s13, %s752_s13 }
  0x5c   :  { %894 = vmatprep.subr.bf16.mxu0 %v997_v1  ;;  %v1008_v6 = vld [vmem:[#allocation7] sm:$0xff]   ;;  %v1001_v8 = vld [vmem:[#allocation5 + $0x28] sm:$0xff]   ;;  %v1002_v10 = vld [vmem:[#allocation5 + $0x30] sm:$0xff]  }
  0x5d   :  { %916 = vmatprep.subr.bf16.mxu1 %v1008_v6  ;;  %v1011_v11 = vld [vmem:[#allocation7 + $0x18] sm:$0xff]   ;;  %v1012_v13 = vld [vmem:[#allocation7 + $0x20] sm:$0xff]   ;;  %v1013_v14 = vld [vmem:[#allocation7 + $0x28] sm:$0xff]  }
  0x5e   :  { %917 = vmatpush3.bf16.msra.mxu1 %v1008_v6  ;;  %v1003_v12 = vld [vmem:[#allocation5 + $0x38] sm:$0xff]   ;;  %v1005_v15 = vld [vmem:[#allocation2 + $0x8] sm:$0xff]   ;;  %v1006_v16 = vld [vmem:[#allocation2 + $0x10] sm:$0xff]  }
  0x5f   :  { %895 = vmatpush3.bf16.msra.mxu0 %v997_v1  ;;  %918 = vmatprep.subr.bf16.mxu1 %v1009_v7  ;;  %v1007_v17 = vld [vmem:[#allocation2 + $0x18] sm:$0xff]   ;;  %v1014_v18 = vld [vmem:[#allocation7 + $0x30] sm:$0xff]   ;;  %v1016_v20 = vld [vmem:[#allocation8] sm:$0xff]  }
  0x60   :  { %896 = vmatprep.subr.bf16.mxu0 %v998_v2  ;;  %v1015_v19 = vld [vmem:[#allocation7 + $0x38] sm:$0xff]   ;;  %v1017_v21 = vld [vmem:[#allocation8 + $0x8] sm:$0xff]   ;;  %v1018_v22 = vld [vmem:[#allocation8 + $0x10] sm:$0xff]  }
  0x61   :  { %v1019_v23 = vld [vmem:[#allocation8 + $0x18] sm:$0xff]   ;;  %v1020_v24 = vld [vmem:[#allocation8 + $0x20] sm:$0xff]   ;;  %v1021_v25 = vld [vmem:[#allocation8 + $0x28] sm:$0xff]  }
  0x62   :  { %919 = vmatpush3.bf16.msra.mxu1 %v1009_v7  ;;  %v765_v26 = vld [vmem:[%s1348_s2] ss:$0 sm:$0xff]  ;;  %v1022_v55 = vld [vmem:[#allocation8 + $0x30] sm:$0xff]   ;;  %v1023_v56 = vld [vmem:[#allocation8 + $0x38] sm:$0xff]  }
  0x63   :  { %897 = vmatpush3.bf16.msra.mxu0 %v998_v2  ;;  %920 = vmatprep.subr.bf16.mxu1 %v1010_v9  ;;  %v1024_v57 = vld [vmem:[#allocation10] sm:$0xff]   ;;  %v1025_v58 = vld [vmem:[#allocation10 + $0x8] sm:$0xff]   ;;  %v1026_v59 = vld [vmem:[#allocation10 + $0x10] sm:$0xff]  }
  0x64   :  { %898 = vmatprep.subr.bf16.mxu0 %v999_v3  ;;  %v1027_v60 = vld [vmem:[#allocation10 + $0x18] sm:$0xff]   ;;  %v1028_v61 = vld [vmem:[#allocation10 + $0x20] sm:$0xff]   ;;  %v1029_v62 = vld [vmem:[#allocation10 + $0x28] sm:$0xff]  }
  0x65   :  { %v778_v63 = vld [vmem:[%s1350_s4] ss:$0 sm:$0xff] }
  0x66   :  { %921 = vmatpush3.bf16.msra.mxu1 %v1010_v9 }
  0x67   :  { %899 = vmatpush3.bf16.msra.mxu0 %v999_v3  ;;  %922 = vmatprep.subr.bf16.mxu1 %v1011_v11 }
  0x68   :  { %900 = vmatprep.subr.bf16.mxu0 %v1000_v5 }
  0x6a   :  { %923 = vmatpush3.bf16.msra.mxu1 %v1011_v11 }
  0x6b   :  { %901 = vmatpush3.bf16.msra.mxu0 %v1000_v5  ;;  %924 = vmatprep.subr.bf16.mxu1 %v1012_v13 }
  0x6c   :  { %902 = vmatprep.subr.bf16.mxu0 %v1001_v8 }
  0x6e   :  { %925 = vmatpush3.bf16.msra.mxu1 %v1012_v13 }
  0x6f   :  { %903 = vmatpush3.bf16.msra.mxu0 %v1001_v8  ;;  %926 = vmatprep.subr.bf16.mxu1 %v1013_v14 }
  0x70   :  { %904 = vmatprep.subr.bf16.mxu0 %v1002_v10 }
  0x72   :  { %927 = vmatpush3.bf16.msra.mxu1 %v1013_v14 }
  0x73   :  { %905 = vmatpush3.bf16.msra.mxu0 %v1002_v10  ;;  %928 = vmatprep.subr.bf16.mxu1 %v1014_v18 }
  0x74   :  { %906 = vmatprep.subr.bf16.mxu0 %v1003_v12 }
  0x76   :  { %929 = vmatpush3.bf16.msra.mxu1 %v1014_v18 }
  0x77   :  { %907 = vmatpush3.bf16.msra.mxu0 %v1003_v12  ;;  %930 = vmatprep.subr.bf16.mxu1 %v1015_v19 }
  0x78   :  { %940 = vmatprep.subr.bf16.mxu0 %v1016_v20 }
  0x7a   :  { %909 = vmatmul.mubr.bf16.vlgmr.msra.gmra.mrb[0].mxu0 %v1005_v15  ;;  %931 = vmatpush3.bf16.msra.mxu1 %v1015_v19 }
  0x7b   :  { %912 = vmatprep.mubr.bf16.mxu0 %v1006_v16  ;;  %941 = vmatpush3.bf16.msra.mxu0 %v1016_v20 }
  0x7c   :  { %942 = vmatprep.subr.bf16.mxu0 %v1017_v21  ;;  %964 = vmatprep.subr.bf16.mxu1 %v1024_v57 }
  0x7f   :  { %943 = vmatpush3.bf16.msra.mxu0 %v1017_v21 }
  0x80   :  { %944 = vmatprep.subr.bf16.mxu0 %v1018_v22 }
  0x82   :  { %913 = vmatmul.mubr.bf16.gmra.mrb[4].mxu0 %v1007_v17 }
  0x83   :  { %945 = vmatpush3.bf16.msra.mxu0 %v1018_v22 }
  0x84   :  { %946 = vmatprep.subr.bf16.mxu0 %v1019_v23 }
  0x87   :  { %947 = vmatpush3.bf16.msra.mxu0 %v1019_v23 }
  0x88   :  { %948 = vmatprep.subr.bf16.mxu0 %v1020_v24 }
  0x8b   :  { %949 = vmatpush3.bf16.msra.mxu0 %v1020_v24 }
  0x8c   :  { %950 = vmatprep.subr.bf16.mxu0 %v1021_v25 }
  0x8f   :  { %951 = vmatpush3.bf16.msra.mxu0 %v1021_v25 }
  0x90   :  { %952 = vmatprep.subr.bf16.mxu0 %v1022_v55 }
  0x93   :  { %953 = vmatpush3.bf16.msra.mxu0 %v1022_v55 }
  0x94   :  { %954 = vmatprep.subr.bf16.mxu0 %v1023_v56 }
  0x97   :  { %955 = vmatpush3.bf16.msra.mxu0 %v1023_v56 }
 0x14d   :  { %v910_v27 = vpop.f32.mrb[0].mxu0 }
 0x14e   :  { %v248_v28 = vadd.f32 %v910_v27, %v765_v26  ;;  %v239_v29 = vpop.f32.mrb[1].mxu0 }
 0x14f   :  { %v240_v30 = vadd.f32 %v765_v26, %v239_v29  ;;  %v911_v31 = vpop.f32.mrb[2].mxu0  ;;  %v1031_v29 = vld [vmem:[#allocation10 + $0x38] sm:$0xff]  }
 0x150   :  { %v251_v32 = vadd.f32 %v911_v31, %v765_v26  ;;  %v242_v33 = vpop.f32.mrb[3].mxu0  ;;  %v272_v35 = vmax.f32 %v248_v28, 0.0  ;;  %v1030_v28 = vld [vmem:[#allocation10 + $0x30] sm:$0xff]   ;;  %v787_v31 = vld [vmem:[%s1352_s6] ss:$0 sm:$0xff] }
 0x151   :  { %v243_v34 = vadd.f32 %v765_v26, %v242_v33  ;;  %v270_v37 = vmax.f32 %v240_v30, 0.0 }
 0x152   :  { %v273_v36 = vmax.f32 %v251_v32, 0.0 }
 0x153   :  { %v271_v38 = vmax.f32 %v243_v34, 0.0 }
 0x154   :  { %v279_v39 = vpack.c.bf16 %v273_v36, %v272_v35 }
 0x155   :  { %v914_v40 = vpop.f32.mrb[4].mxu0  ;;  %v278_v41 = vpack.c.bf16 %v271_v38, %v270_v37 }
 0x156   :  { %v264_v42 = vadd.f32 %v914_v40, %v765_v26  ;;  %v255_v43 = vpop.f32.mrb[5].mxu0 }
 0x157   :  { %v256_v44 = vadd.f32 %v765_v26, %v255_v43  ;;  %v915_v45 = vpop.f32.mrb[6].mxu0  ;;  %932 = vmatprep.mubr.bf16.mxu1 %v278_v41 }
 0x158   :  { %v267_v46 = vadd.f32 %v915_v45, %v765_v26  ;;  %v258_v47 = vpop.f32.mrb[7].mxu0  ;;  %933 = vmatmul.mubr.bf16.vlgmr.msra.gmra.mrb[0].mxu1 %v279_v39  ;;  %v276_v49 = vmax.f32 %v264_v42, 0.0 }
 0x159   :  { %v259_v48 = vadd.f32 %v765_v26, %v258_v47  ;;  %v274_v51 = vmax.f32 %v256_v44, 0.0  ;;  %965 = vmatpush3.bf16.msra.mxu1 %v1024_v57 }
 0x15a   :  { %v277_v50 = vmax.f32 %v267_v46, 0.0  ;;  %966 = vmatprep.subr.bf16.mxu1 %v1025_v58 }
 0x15b   :  { %v275_v52 = vmax.f32 %v259_v48, 0.0 }
 0x15c   :  { %v281_v53 = vpack.c.bf16 %v277_v50, %v276_v49 }
 0x15d   :  { %v280_v54 = vpack.c.bf16 %v275_v52, %v274_v51  ;;  %967 = vmatpush3.bf16.msra.mxu1 %v1025_v58  ;;  %v796_v52 = vld [vmem:[%s1354_s8] ss:$0 sm:$0xff]  ;;  %s1142_s8 = scalar_lea.vmem %s752_s13, 512 }
 0x15e   :  { %968 = vmatprep.subr.bf16.mxu1 %v1026_v59  ;;  %p1143_p12 = scmp.ne.s32.totalorder %s752_s13, %s1142_s8  ;;  %p1148_p0 = scmp.lt.s32.totalorder %s1142_s8, %s1142_s8 }
 0x15f   :  { %936 = vmatprep.mubr.bf16.mxu1 %v280_v54 }
 0x160   :  { %937 = vmatmul.mubr.bf16.gmra.mrb[4].mxu1 %v281_v53  ;;  %p1149_p1 = por %p1148_p0, %p1147_p13 }
 0x161   :  { %969 = vmatpush3.bf16.msra.mxu1 %v1026_v59 }
 0x162   :  { %970 = vmatprep.subr.bf16.mxu1 %v1027_v60  ;;  %p1150_p2 = pnand %p1149_p1, %p1143_p12 }
 0x165   :  { %971 = vmatpush3.bf16.msra.mxu1 %v1027_v60 }
 0x166   :  { %972 = vmatprep.subr.bf16.mxu1 %v1028_v61 }
 0x169   :  { %973 = vmatpush3.bf16.msra.mxu1 %v1028_v61 }
 0x16a   :  { %974 = vmatprep.subr.bf16.mxu1 %v1029_v62 }
 0x16d   :  { %975 = vmatpush3.bf16.msra.mxu1 %v1029_v62 }
 0x16e   :  { %976 = vmatprep.subr.bf16.mxu1 %v1030_v28 }
 0x171   :  { %977 = vmatpush3.bf16.msra.mxu1 %v1030_v28 }
 0x172   :  { %978 = vmatprep.subr.bf16.mxu1 %v1031_v29 }
 0x175   :  { %979 = vmatpush3.bf16.msra.mxu1 %v1031_v29 }
 0x22b   :  { %v934_v0 = vpop.f32.mrb[0].mxu1 }
 0x22c   :  { %v396_v1 = vadd.f32 %v934_v0, %v778_v63  ;;  %v387_v2 = vpop.f32.mrb[1].mxu1 }
 0x22d   :  { %v388_v3 = vadd.f32 %v778_v63, %v387_v2  ;;  %v935_v4 = vpop.f32.mrb[2].mxu1 }
 0x22e   :  { %v399_v5 = vadd.f32 %v935_v4, %v778_v63  ;;  %v390_v6 = vpop.f32.mrb[3].mxu1  ;;  %v420_v8 = vmax.f32 %v396_v1, 0.0 }
 0x22f   :  { %v391_v7 = vadd.f32 %v778_v63, %v390_v6  ;;  %v418_v10 = vmax.f32 %v388_v3, 0.0 }
 0x230   :  { %v421_v9 = vmax.f32 %v399_v5, 0.0 }
 0x231   :  { %v419_v11 = vmax.f32 %v391_v7, 0.0 }
 0x232   :  { %v427_v12 = vpack.c.bf16 %v421_v9, %v420_v8 }
 0x233   :  { %v426_v13 = vpack.c.bf16 %v419_v11, %v418_v10  ;;  %v938_v14 = vpop.f32.mrb[4].mxu1 }
 0x234   :  { %v412_v15 = vadd.f32 %v938_v14, %v778_v63  ;;  %v403_v16 = vpop.f32.mrb[5].mxu1 }
 0x235   :  { %v404_v17 = vadd.f32 %v778_v63, %v403_v16  ;;  %v939_v18 = vpop.f32.mrb[6].mxu1  ;;  %956 = vmatprep.mubr.bf16.mxu0 %v426_v13 }
 0x236   :  { %v415_v19 = vadd.f32 %v939_v18, %v778_v63  ;;  %v406_v20 = vpop.f32.mrb[7].mxu1  ;;  %957 = vmatmul.mubr.bf16.vlgmr.msra.gmra.mrb[8].mxu0 %v427_v12  ;;  %v424_v22 = vmax.f32 %v412_v15, 0.0 }
 0x237   :  { %v407_v21 = vadd.f32 %v778_v63, %v406_v20  ;;  %v422_v24 = vmax.f32 %v404_v17, 0.0 }
 0x238   :  { %v425_v23 = vmax.f32 %v415_v19, 0.0 }
 0x239   :  { %v423_v25 = vmax.f32 %v407_v21, 0.0 }
 0x23a   :  { %v429_v26 = vpack.c.bf16 %v425_v23, %v424_v22 }
 0x23b   :  { %v428_v27 = vpack.c.bf16 %v423_v25, %v422_v24 }
 0x23d   :  { %960 = vmatprep.mubr.bf16.mxu0 %v428_v27 }
 0x23e   :  { %961 = vmatmul.mubr.bf16.gmra.mrb[12].mxu0 %v429_v26 }
 0x309   :  { %v958_v30 = vpop.f32.mrb[8].mxu0 }
 0x30a   :  { %v535_v32 = vpop.f32.mrb[9].mxu0  ;;  %v544_v34 = vadd.f32 %v958_v30, %v787_v31 }
 0x30b   :  { %v959_v33 = vpop.f32.mrb[10].mxu0  ;;  %v536_v37 = vadd.f32 %v787_v31, %v535_v32 }
 0x30c   :  { %v547_v35 = vadd.f32 %v959_v33, %v787_v31  ;;  %v538_v36 = vpop.f32.mrb[11].mxu0 }
 0x30d   :  { %v539_v38 = vadd.f32 %v787_v31, %v538_v36 }
 0x30e   :  { %v567_v39 = vpack.c.bf16 %v547_v35, %v544_v34 }
 0x30f   :  { %v566_v40 = vpack.c.bf16 %v539_v38, %v536_v37 }
 0x311   :  { %v962_v41 = vpop.f32.mrb[12].mxu0  ;;  %980 = vmatprep.mubr.bf16.mxu1 %v566_v40 }
 0x312   :  { %v551_v42 = vpop.f32.mrb[13].mxu0  ;;  %981 = vmatmul.mubr.bf16.vlgmr.msra.gmra.mrb[8].mxu1 %v567_v39  ;;  %v560_v44 = vadd.f32 %v962_v41, %v787_v31 }
 0x313   :  { %v963_v43 = vpop.f32.mrb[14].mxu0  ;;  %v552_v47 = vadd.f32 %v787_v31, %v551_v42 }
 0x314   :  { %v563_v45 = vadd.f32 %v963_v43, %v787_v31  ;;  %v554_v46 = vpop.f32.mrb[15].mxu0 }
 0x315   :  { %v555_v48 = vadd.f32 %v787_v31, %v554_v46 }
 0x316   :  { %v569_v49 = vpack.c.bf16 %v563_v45, %v560_v44 }
 0x317   :  { %v568_v50 = vpack.c.bf16 %v555_v48, %v552_v47 }
 0x319   :  { %984 = vmatprep.mubr.bf16.mxu1 %v568_v50 }
 0x31a   :  { %985 = vmatmul.mubr.bf16.gmra.mrb[12].mxu1 %v569_v49 }
 0x3e5   :  { %v982_v51 = vpop.f32.mrb[8].mxu1 }
 0x3e6   :  { %v675_v53 = vpop.f32.mrb[9].mxu1  ;;  %v684_v55 = vadd.f32 %v982_v51, %v796_v52 }
 0x3e7   :  { %v983_v54 = vpop.f32.mrb[10].mxu1  ;;  %v676_v58 = vadd.f32 %v796_v52, %v675_v53 }
 0x3e8   :  { %v687_v56 = vadd.f32 %v983_v54, %v796_v52  ;;  %v678_v57 = vpop.f32.mrb[11].mxu1 }
 0x3e9   :  { %v679_v59 = vadd.f32 %v796_v52, %v678_v57 }
 0x3ea   :  { %v829_v60 = vpack.c.bf16 %v687_v56, %v684_v55 }
 0x3eb   :  { %v824_v61 = vpack.c.bf16 %v679_v59, %v676_v58 }
 0x3ec   :  { %841 = vst [vmem:[#allocation11 + $0x8] sm:$0xff] %v829_v60  }
 0x3ed   :  { %825 = vst [vmem:[#allocation11] sm:$0xff] %v824_v61   ;;  %v986_v62 = vpop.f32.mrb[12].mxu1 }
 0x3ee   :  { %v691_v63 = vpop.f32.mrb[13].mxu1  ;;  %v700_v1 = vadd.f32 %v986_v62, %v796_v52 }
 0x3ef   :  { %v987_v0 = vpop.f32.mrb[14].mxu1  ;;  %v692_v4 = vadd.f32 %v796_v52, %v691_v63 }
 0x3f0   :  { %v703_v2 = vadd.f32 %v987_v0, %v796_v52  ;;  %v694_v3 = vpop.f32.mrb[15].mxu1 }
 0x3f1   :  { %v695_v5 = vadd.f32 %v796_v52, %v694_v3 }
 0x3f2   :  { %v839_v6 = vpack.c.bf16 %v703_v2, %v700_v1 }
 0x3f3   :  { %v834_v7 = vpack.c.bf16 %v695_v5, %v692_v4 }
 0x3f4   :  { %843 = vst [vmem:[#allocation11 + $0x18] sm:$0xff] %v839_v6  }
 0x3f5   :  { %842 = vst [vmem:[#allocation11 + $0x10] sm:$0xff] %v834_v7  }
 0x3f6   :  { %1153 = shalt.err (!%p1150_p2)
}
 0x3f7   :  { %s1154_s14 = scalar_lea.hbm %s1355_s9, 512 }
 0x3f8   :  { %p1155_p3 = scmp.ne.s32.totalorder %s1355_s9, %s1154_s14  ;;  %p1158_p4 = scmp.lt.u32.totalorder %s1154_s14, %s1355_s9 }
 0x3fa   :  { %p1160_p5 = pnand %p1158_p4, %p1155_p3 }
 0x3fc   :  { %1163 = shalt.err (!%p1160_p5)
}
 0x3fd   :  { %757 = dma.vmem_to_hbm [thread:$0]  %s752_s13, 512, %s1355_s9, [#allocation4], %s1174_s21, %s1174_s21, %s1175_s22  }
 0x3fe   :  { %1170 = dma.done.wait [#allocation4], 512  }
 0x3ff   :  { %1171 = vsyncadd [#allocation4], 4294966784 }
 0x400   :  { %761 = vsyncpa [#allocation3], 1 }
 0x401   :  { %762 = vsyncpa [#allocation6], 1 }
 0x402   :  { %763 = vsyncpa [#allocation9], 1 }
 0x403   :  { %764 = vsyncpa [#allocation4], 1 }

</bundles_post_ra>
